<compile_context>
chip_gen: v6e
topology: v6e:2x2x1
jax: 0.10.0
libtpu: 0.0.40
codegen_flags: <defaults>
</compile_context>

<pallas_src>
import jax
import jax.numpy as jnp
from jax.experimental import pallas as pl
from jax.experimental.pallas import tpu as pltpu

NEG_INF = -1e9
OUT_PAD = 128   # lane-dense padded output width for both decoder heads


# ----------------------------------------------------------------------------
# Fused DenseTNT kernel: one grid step = one batch element.
#   vec_ref  : (1, 2, C*L, F)  obstacle / lane vectors (type axis 0/1)
#   vmask_ref: (1, 2, C, L)    per-vector validity (float 0/1)
#   cmask_ref: (1, 1, 2C)      per-polyline validity (float 0/1)
#   qpts_ref : (1, S+1, 2)     [candidate target points ; last GT goal]
#   enc_w/b  : (2, F, H) / (2, 1, H)   per-type encoder MLP
#   dec_*    : stacked [intention, traj] decoder params, out dim padded to OUT_PAD
#   out_ref  : (1, S+1, OUT_PAD)  rows 0..S-1 = intention head, row S = traj head
# ----------------------------------------------------------------------------
def dense_tnt_kernel(vec_ref, vmask_ref, cmask_ref, qpts_ref,
                     enc_w_ref, enc_b_ref,
                     dec_wq_ref, dec_bq_ref, dec_w1_ref, dec_b1_ref,
                     dec_w2_ref, dec_b2_ref,
                     out_ref):
    vec = vec_ref[0]          # (2, C*L, F)
    vmask = vmask_ref[0]      # (2, C, L)
    cmask = cmask_ref[0]      # (1, 2C)
    qpts = qpts_ref[0]        # (S+1, 2)

    C = vmask.shape[1]
    L = vmask.shape[2]
    H = enc_w_ref.shape[2]
    S = qpts.shape[0] - 1

    # ---- ContextEncoder: per-type MLP + masked max-pool over vectors ------
    pooled_types = []
    for t in range(2):
        x = vec[t]                                                   # (C*L, F)
        h = jnp.maximum(
            jnp.dot(x, enc_w_ref[t], preferred_element_type=jnp.float32)
            + enc_b_ref[t], 0.0)                                     # (C*L, H)
        h = h.reshape(C, L, H)
        vm = vmask[t]                                                # (C, L)
        hm = jnp.where(vm[..., None] > 0.0, h, NEG_INF)
        pooled = jnp.max(hm, axis=1)                                 # (C, H)
        valid = jnp.max(vm, axis=1, keepdims=True) > 0.0             # (C, 1)
        pooled_types.append(jnp.where(valid, pooled, 0.0))
    ctx = jnp.concatenate(pooled_types, axis=0)                      # (2C, H)

    # Transposed context for the scores matmul (computed once, shared by both
    # heads); fold the 1/sqrt(H) attention scale in here.
    ctx_t = ctx.T * (1.0 / float(H) ** 0.5)                          # (H, 2C)
    mask_keep = cmask > 0.0                                          # (1, 2C)
    mask_mult = jnp.where(mask_keep, 1.0, 0.0)

    def attn_head(pts, hi):
        q = jnp.maximum(
            jnp.dot(pts, dec_wq_ref[hi], preferred_element_type=jnp.float32)
            + dec_bq_ref[hi], 0.0)                                   # (Sq, H)
        s = jnp.dot(q, ctx_t, preferred_element_type=jnp.float32)    # (Sq, 2C)
        s = jnp.where(mask_keep, s, NEG_INF)
        s = s - jnp.max(s, axis=-1, keepdims=True)
        p = jnp.exp(s) * mask_mult
        # Guard against a fully masked batch (denom == 0 -> NaN otherwise).
        denom = jnp.maximum(jnp.sum(p, axis=-1, keepdims=True), 1e-20)
        p = p * pl.reciprocal(denom, approx=True)
        att = jnp.dot(p, ctx, preferred_element_type=jnp.float32)    # (Sq, H)
        qa = jnp.concatenate([q, att], axis=-1)                      # (Sq, 2H)
        hid = jnp.maximum(
            jnp.dot(qa, dec_w1_ref[hi], preferred_element_type=jnp.float32)
            + dec_b1_ref[hi], 0.0)
        return (jnp.dot(hid, dec_w2_ref[hi], preferred_element_type=jnp.float32)
                + dec_b2_ref[hi])                                    # (Sq, OUT_PAD)

    intention_out = attn_head(qpts[:S], 0)   # (S, OUT_PAD), scores in column 0
    traj_out = attn_head(qpts[S:], 1)        # (1, OUT_PAD), traj in cols 0..2T-1
    out_ref[0] = jnp.concatenate([intention_out, traj_out],
                                 axis=0).astype(out_ref.dtype)


# ----------------------------------------------------------------------------
# Parameters & wrapper
# ----------------------------------------------------------------------------
def init_params(key, F, H, pred_steps):
    ks = jax.random.split(key, 16)
    s = 0.1

    def n(k, shape):
        return jax.random.normal(k, shape, jnp.float32) * s

    def head(keys, out_dim):
        return {
            "wq": n(keys[0], (2, H)),  "bq": jnp.zeros((1, H), jnp.float32),
            "w1q": n(keys[1], (H, H)), "w1a": n(keys[2], (H, H)),
            "b1": jnp.zeros((1, H), jnp.float32),
            "w2": n(keys[3], (H, out_dim)),
            "b2": jnp.zeros((1, out_dim), jnp.float32),
        }

    return {
        "enc": [  # one encoder per vector type (obstacle, lane/map)
            {"w": n(ks[0], (F, H)), "b": jnp.zeros((1, H), jnp.float32)},
            {"w": n(ks[1], (F, H)), "b": jnp.zeros((1, H), jnp.float32)},
        ],
        "intention": head(ks[2:6], 1),
        "traj": head(ks[6:10], 2 * pred_steps),
    }


def _pack_decoder_params(p_int, p_traj, H):
    """Stack intention/traj head params and pad output heads to OUT_PAD lanes."""
    def pad_out(w, b):
        o = w.shape[1]
        w_p = jnp.zeros((H, OUT_PAD), jnp.float32).at[:, :o].set(w)
        b_p = jnp.zeros((1, OUT_PAD), jnp.float32).at[:, :o].set(b)
        return w_p, b_p

    w2_i, b2_i = pad_out(p_int["w2"], p_int["b2"])
    w2_t, b2_t = pad_out(p_traj["w2"], p_traj["b2"])
    return {
        "wq": jnp.stack([p_int["wq"], p_traj["wq"]]),                 # (2, 2, H)
        "bq": jnp.stack([p_int["bq"], p_traj["bq"]]),                 # (2, 1, H)
        "w1": jnp.stack([jnp.concatenate([p_int["w1q"], p_int["w1a"]], axis=0),
                         jnp.concatenate([p_traj["w1q"], p_traj["w1a"]], axis=0)]),
        "b1": jnp.stack([p_int["b1"], p_traj["b1"]]),                 # (2, 1, H)
        "w2": jnp.stack([w2_i, w2_t]),                                # (2, H, OUT_PAD)
        "b2": jnp.stack([b2_i, b2_t]),                                # (2, 1, OUT_PAD)
    }


def dense_tnt_forward(params, vectors, vector_masks, cluster_masks, target_info,
                      pred_steps):
    obs_vec, lane_vec = vectors
    B, C, L, F = obs_vec.shape
    H = params["enc"][0]["w"].shape[1]

    cand_points = target_info[0]                                     # (B, S, 2)
    S = cand_points.shape[1]
    last_goal = target_info[1][:, -1:, :]                            # (B, 1, 2)

    # --- glue: pack inputs / params into kernel-friendly stacked layouts ---
    vec_stacked = jnp.stack([obs_vec, lane_vec], axis=1).reshape(B, 2, C * L, F)
    vmask_stacked = jnp.stack([vector_masks[0], vector_masks[1]],
                              axis=1).astype(jnp.float32)            # (B, 2, C, L)
    cmask = jnp.concatenate([cluster_masks[0], cluster_masks[1]],
                            axis=1).astype(jnp.float32)[:, None, :]  # (B, 1, 2C)
    qpts = jnp.concatenate([cand_points, last_goal], axis=1)         # (B, S+1, 2)

    enc_w = jnp.stack([params["enc"][0]["w"], params["enc"][1]["w"]])  # (2, F, H)
    enc_b = jnp.stack([params["enc"][0]["b"], params["enc"][1]["b"]])  # (2, 1, H)
    dec = _pack_decoder_params(params["intention"], params["traj"], H)

    out = pl.pallas_call(
        dense_tnt_kernel,
        out_shape=jax.ShapeDtypeStruct((B, S + 1, OUT_PAD), jnp.float32),
        grid=(B,),
        in_specs=[
            pl.BlockSpec((1, 2, C * L, F), lambda b: (b, 0, 0, 0)),
            pl.BlockSpec((1, 2, C, L), lambda b: (b, 0, 0, 0)),
            pl.BlockSpec((1, 1, 2 * C), lambda b: (b, 0, 0)),
            pl.BlockSpec((1, S + 1, 2), lambda b: (b, 0, 0)),
            pl.BlockSpec((2, F, H), lambda b: (0, 0, 0)),
            pl.BlockSpec((2, 1, H), lambda b: (0, 0, 0)),
            pl.BlockSpec((2, 2, H), lambda b: (0, 0, 0)),
            pl.BlockSpec((2, 1, H), lambda b: (0, 0, 0)),
            pl.BlockSpec((2, 2 * H, H), lambda b: (0, 0, 0)),
            pl.BlockSpec((2, 1, H), lambda b: (0, 0, 0)),
            pl.BlockSpec((2, H, OUT_PAD), lambda b: (0, 0, 0)),
            pl.BlockSpec((2, 1, OUT_PAD), lambda b: (0, 0, 0)),
        ],
        out_specs=pl.BlockSpec((1, S + 1, OUT_PAD), lambda b: (b, 0, 0)),
        compiler_params=pltpu.CompilerParams(
            dimension_semantics=("parallel",)),
    )(vec_stacked, vmask_stacked, cmask, qpts,
      enc_w, enc_b,
      dec["wq"], dec["bq"], dec["w1"], dec["b1"], dec["w2"], dec["b2"])

    target_score_raws = out[:, :S, 0]                                # (B, S)
    traj = out[:, S, :2 * pred_steps].reshape(B, pred_steps, 2)
    return target_score_raws, traj


# ----------------------------------------------------------------------------
if __name__ == "__main__":
    B, C, L, F = 2, 4, 8, 8     # batch, polylines/type, vectors/polyline, feature
    H = 32                      # hidden size
    S = 8                       # number of candidate target points
    I = 3                       # number of GT goals (3s / 5s / 8s)
    PRED_STEPS = 5              # trajectory length

    key = jax.random.PRNGKey(0)
    k_par, k_obs, k_lane, k_mo, k_ml, k_cand, k_gt = jax.random.split(key, 7)

    params = init_params(k_par, F, H, PRED_STEPS)

    obs_vec = jax.random.normal(k_obs, (B, C, L, F), jnp.float32)
    lane_vec = jax.random.normal(k_lane, (B, C, L, F), jnp.float32)
    obs_vmask = (jax.random.uniform(k_mo, (B, C, L)) > 0.2).astype(jnp.float32)
    lane_vmask = (jax.random.uniform(k_ml, (B, C, L)) > 0.2).astype(jnp.float32)
    obs_cmask = (jnp.max(obs_vmask, axis=-1) > 0).astype(jnp.float32)
    lane_cmask = (jnp.max(lane_vmask, axis=-1) > 0).astype(jnp.float32)

    vectors = [obs_vec, lane_vec]
    vector_masks = [obs_vmask, lane_vmask]
    cluster_masks = [obs_cmask, lane_cmask]
    cand_target_points = jax.random.normal(k_cand, (B, S, 2), jnp.float32)
    gt_target_grid_center = jax.random.normal(k_gt, (B, I, 2), jnp.float32)
    target_info = [cand_target_points, gt_target_grid_center]

    target_score_raws, traj = dense_tnt_forward(
        params, vectors, vector_masks, cluster_masks, target_info, PRED_STEPS)
    jax.block_until_ready((target_score_raws, traj))

    assert target_score_raws.shape == (B, S)
    assert traj.shape == (B, PRED_STEPS, 2)
    assert bool(jnp.all(jnp.isfinite(target_score_raws)))
    assert bool(jnp.all(jnp.isfinite(traj)))
    print("KERNEL_OK")
</pallas_src>

<mosaic_0001>
module attributes {stable_mosaic.version = 11 : i64} {
  func.func @dense_tnt_kernel(%arg0: i32, %arg1: memref<1x2x32x8xf32, #tpu.memory_space<vmem>>, %arg2: memref<1x2x4x8xf32, #tpu.memory_space<vmem>>, %arg3: memref<1x1x8xf32, #tpu.memory_space<vmem>>, %arg4: memref<1x9x2xf32, #tpu.memory_space<vmem>>, %arg5: memref<2x8x32xf32, #tpu.memory_space<vmem>>, %arg6: memref<2x1x32xf32, #tpu.memory_space<vmem>>, %arg7: memref<2x2x32xf32, #tpu.memory_space<vmem>>, %arg8: memref<2x1x32xf32, #tpu.memory_space<vmem>>, %arg9: memref<2x64x32xf32, #tpu.memory_space<vmem>>, %arg10: memref<2x1x32xf32, #tpu.memory_space<vmem>>, %arg11: memref<2x32x128xf32, #tpu.memory_space<vmem>>, %arg12: memref<2x1x128xf32, #tpu.memory_space<vmem>>, %arg13: memref<1x9x128xf32, #tpu.memory_space<vmem>>) attributes {dimension_semantics = [#tpu.dimension_semantics<parallel>], iteration_bounds = array<i64: 2>, scalar_prefetch = 0 : i64, scratch_operands = 0 : i64, tpu.core_type = #tpu.core_type<tc>, window_params = [{transform_indices = @transform_0, window_bounds = array<i64: 1, 2, 32, 8>}, {transform_indices = @transform_1, window_bounds = array<i64: 1, 2, 4, 8>}, {transform_indices = @transform_2, window_bounds = array<i64: 1, 1, 8>}, {transform_indices = @transform_3, window_bounds = array<i64: 1, 9, 2>}, {pipeline_mode = #tpu.pipeline_mode<synchronous>, transform_indices = @transform_4, window_bounds = array<i64: 2, 8, 32>}, {pipeline_mode = #tpu.pipeline_mode<synchronous>, transform_indices = @transform_5, window_bounds = array<i64: 2, 1, 32>}, {pipeline_mode = #tpu.pipeline_mode<synchronous>, transform_indices = @transform_6, window_bounds = array<i64: 2, 2, 32>}, {pipeline_mode = #tpu.pipeline_mode<synchronous>, transform_indices = @transform_7, window_bounds = array<i64: 2, 1, 32>}, {pipeline_mode = #tpu.pipeline_mode<synchronous>, transform_indices = @transform_8, window_bounds = array<i64: 2, 64, 32>}, {pipeline_mode = #tpu.pipeline_mode<synchronous>, transform_indices = @transform_9, window_bounds = array<i64: 2, 1, 32>}, {pipeline_mode = #tpu.pipeline_mode<synchronous>, transform_indices = @transform_10, window_bounds = array<i64: 2, 32, 128>}, {pipeline_mode = #tpu.pipeline_mode<synchronous>, transform_indices = @transform_11, window_bounds = array<i64: 2, 1, 128>}, {transform_indices = @transform_12, window_bounds = array<i64: 1, 9, 128>}]} {
    %c0 = arith.constant 0 : index
    %c0_0 = arith.constant 0 : index
    %c0_1 = arith.constant 0 : index
    %c0_2 = arith.constant 0 : index
    %0 = vector.load %arg1[%c0, %c0_0, %c0_1, %c0_2] : memref<1x2x32x8xf32, #tpu.memory_space<vmem>>, vector<1x2x32x8xf32>
    %1 = vector.shape_cast %0 : vector<1x2x32x8xf32> to vector<2x32x8xf32>
    %c0_3 = arith.constant 0 : index
    %c0_4 = arith.constant 0 : index
    %c0_5 = arith.constant 0 : index
    %c0_6 = arith.constant 0 : index
    %2 = vector.load %arg2[%c0_3, %c0_4, %c0_5, %c0_6] : memref<1x2x4x8xf32, #tpu.memory_space<vmem>>, vector<1x2x4x8xf32>
    %3 = vector.shape_cast %2 : vector<1x2x4x8xf32> to vector<2x4x8xf32>
    %c0_7 = arith.constant 0 : index
    %c0_8 = arith.constant 0 : index
    %c0_9 = arith.constant 0 : index
    %4 = vector.load %arg3[%c0_7, %c0_8, %c0_9] : memref<1x1x8xf32, #tpu.memory_space<vmem>>, vector<1x1x8xf32>
    %5 = vector.shape_cast %4 : vector<1x1x8xf32> to vector<1x8xf32>
    %c0_10 = arith.constant 0 : index
    %c0_11 = arith.constant 0 : index
    %c0_12 = arith.constant 0 : index
    %6 = vector.load %arg4[%c0_10, %c0_11, %c0_12] : memref<1x9x2xf32, #tpu.memory_space<vmem>>, vector<1x9x2xf32>
    %7 = vector.shape_cast %6 : vector<1x9x2xf32> to vector<9x2xf32>
    %8 = vector.extract_strided_slice %1 {offsets = [0, 0, 0], sizes = [1, 32, 8], strides = [1, 1, 1]} : vector<2x32x8xf32> to vector<1x32x8xf32>
    %9 = vector.shape_cast %8 : vector<1x32x8xf32> to vector<32x8xf32>
    %c0_13 = arith.constant 0 : index
    %c0_14 = arith.constant 0 : index
    %c0_15 = arith.constant 0 : index
    %10 = vector.load %arg5[%c0_13, %c0_14, %c0_15] : memref<2x8x32xf32, #tpu.memory_space<vmem>>, vector<1x8x32xf32>
    %11 = vector.shape_cast %10 : vector<1x8x32xf32> to vector<8x32xf32>
    %cst = arith.constant dense<0.000000e+00> : vector<32x32xf32>
    %12 = tpu.matmul %9, %11, %cst {dimension_numbers = #tpu.dot_dimension_numbers<[1], [0], [0], [1], [0, 0, 1, 1], [], []>} : vector<32x8xf32>, vector<8x32xf32>, vector<32x32xf32> -> vector<32x32xf32>
    %c0_16 = arith.constant 0 : index
    %c0_17 = arith.constant 0 : index
    %c0_18 = arith.constant 0 : index
    %13 = vector.load %arg6[%c0_16, %c0_17, %c0_18] : memref<2x1x32xf32, #tpu.memory_space<vmem>>, vector<1x1x32xf32>
    %14 = vector.shape_cast %13 : vector<1x1x32xf32> to vector<1x32xf32>
    %15 = vector.broadcast %14 : vector<1x32xf32> to vector<32x32xf32>
    %16 = arith.addf %12, %15 : vector<32x32xf32>
    %cst_19 = arith.constant 0.000000e+00 : f32
    %17 = vector.broadcast %cst_19 : f32 to vector<32x32xf32>
    %18 = arith.maximumf %16, %17 : vector<32x32xf32>
    %19 = vector.shape_cast %18 : vector<32x32xf32> to vector<4x8x32xf32>
    %20 = vector.extract_strided_slice %3 {offsets = [0, 0, 0], sizes = [1, 4, 8], strides = [1, 1, 1]} : vector<2x4x8xf32> to vector<1x4x8xf32>
    %21 = vector.shape_cast %20 : vector<1x4x8xf32> to vector<4x8xf32>
    %22 = vector.shape_cast %21 : vector<4x8xf32> to vector<4x8x1xf32>
    %cst_20 = arith.constant 0.000000e+00 : f32
    %23 = vector.broadcast %cst_20 : f32 to vector<4x8x1xf32>
    %24 = arith.cmpf ogt, %22, %23 : vector<4x8x1xf32>
    %cst_21 = arith.constant -1.000000e+09 : f32
    %25 = vector.shape_cast %24 : vector<4x8x1xi1> to vector<4x8x1xi1>
    %26 = vector.broadcast %25 : vector<4x8x1xi1> to vector<4x8x32xi1>
    %27 = vector.broadcast %cst_21 : f32 to vector<4x8x32xf32>
    %28 = arith.select %26, %19, %27 : vector<4x8x32xi1>, vector<4x8x32xf32>
    %cst_22 = arith.constant dense<0xFF800000> : vector<4x32xf32>
    %29 = vector.multi_reduction <maximumf>, %28, %cst_22 [1] : vector<4x8x32xf32> to vector<4x32xf32>
    %cst_23 = arith.constant dense<0xFF800000> : vector<4xf32>
    %30 = vector.multi_reduction <maximumf>, %21, %cst_23 [1] : vector<4x8xf32> to vector<4xf32>
    %31 = vector.shape_cast %30 : vector<4xf32> to vector<4x1xf32>
    %cst_24 = arith.constant 0.000000e+00 : f32
    %32 = vector.broadcast %cst_24 : f32 to vector<4x1xf32>
    %33 = arith.cmpf ogt, %31, %32 : vector<4x1xf32>
    %cst_25 = arith.constant 0.000000e+00 : f32
    %34 = vector.shape_cast %33 : vector<4x1xi1> to vector<4x1xi1>
    %35 = vector.broadcast %34 : vector<4x1xi1> to vector<4x32xi1>
    %36 = vector.broadcast %cst_25 : f32 to vector<4x32xf32>
    %37 = arith.select %35, %29, %36 : vector<4x32xi1>, vector<4x32xf32>
    %38 = vector.extract_strided_slice %1 {offsets = [1, 0, 0], sizes = [1, 32, 8], strides = [1, 1, 1]} : vector<2x32x8xf32> to vector<1x32x8xf32>
    %39 = vector.shape_cast %38 : vector<1x32x8xf32> to vector<32x8xf32>
    %c1 = arith.constant 1 : index
    %c0_26 = arith.constant 0 : index
    %c0_27 = arith.constant 0 : index
    %40 = vector.load %arg5[%c1, %c0_26, %c0_27] : memref<2x8x32xf32, #tpu.memory_space<vmem>>, vector<1x8x32xf32>
    %41 = vector.shape_cast %40 : vector<1x8x32xf32> to vector<8x32xf32>
    %cst_28 = arith.constant dense<0.000000e+00> : vector<32x32xf32>
    %42 = tpu.matmul %39, %41, %cst_28 {dimension_numbers = #tpu.dot_dimension_numbers<[1], [0], [0], [1], [0, 0, 1, 1], [], []>} : vector<32x8xf32>, vector<8x32xf32>, vector<32x32xf32> -> vector<32x32xf32>
    %c1_29 = arith.constant 1 : index
    %c0_30 = arith.constant 0 : index
    %c0_31 = arith.constant 0 : index
    %43 = vector.load %arg6[%c1_29, %c0_30, %c0_31] : memref<2x1x32xf32, #tpu.memory_space<vmem>>, vector<1x1x32xf32>
    %44 = vector.shape_cast %43 : vector<1x1x32xf32> to vector<1x32xf32>
    %45 = vector.broadcast %44 : vector<1x32xf32> to vector<32x32xf32>
    %46 = arith.addf %42, %45 : vector<32x32xf32>
    %cst_32 = arith.constant 0.000000e+00 : f32
    %47 = vector.broadcast %cst_32 : f32 to vector<32x32xf32>
    %48 = arith.maximumf %46, %47 : vector<32x32xf32>
    %49 = vector.shape_cast %48 : vector<32x32xf32> to vector<4x8x32xf32>
    %50 = vector.extract_strided_slice %3 {offsets = [1, 0, 0], sizes = [1, 4, 8], strides = [1, 1, 1]} : vector<2x4x8xf32> to vector<1x4x8xf32>
    %51 = vector.shape_cast %50 : vector<1x4x8xf32> to vector<4x8xf32>
    %52 = vector.shape_cast %51 : vector<4x8xf32> to vector<4x8x1xf32>
    %cst_33 = arith.constant 0.000000e+00 : f32
    %53 = vector.broadcast %cst_33 : f32 to vector<4x8x1xf32>
    %54 = arith.cmpf ogt, %52, %53 : vector<4x8x1xf32>
    %cst_34 = arith.constant -1.000000e+09 : f32
    %55 = vector.shape_cast %54 : vector<4x8x1xi1> to vector<4x8x1xi1>
    %56 = vector.broadcast %55 : vector<4x8x1xi1> to vector<4x8x32xi1>
    %57 = vector.broadcast %cst_34 : f32 to vector<4x8x32xf32>
    %58 = arith.select %56, %49, %57 : vector<4x8x32xi1>, vector<4x8x32xf32>
    %cst_35 = arith.constant dense<0xFF800000> : vector<4x32xf32>
    %59 = vector.multi_reduction <maximumf>, %58, %cst_35 [1] : vector<4x8x32xf32> to vector<4x32xf32>
    %cst_36 = arith.constant dense<0xFF800000> : vector<4xf32>
    %60 = vector.multi_reduction <maximumf>, %51, %cst_36 [1] : vector<4x8xf32> to vector<4xf32>
    %61 = vector.shape_cast %60 : vector<4xf32> to vector<4x1xf32>
    %cst_37 = arith.constant 0.000000e+00 : f32
    %62 = vector.broadcast %cst_37 : f32 to vector<4x1xf32>
    %63 = arith.cmpf ogt, %61, %62 : vector<4x1xf32>
    %cst_38 = arith.constant 0.000000e+00 : f32
    %64 = vector.shape_cast %63 : vector<4x1xi1> to vector<4x1xi1>
    %65 = vector.broadcast %64 : vector<4x1xi1> to vector<4x32xi1>
    %66 = vector.broadcast %cst_38 : f32 to vector<4x32xf32>
    %67 = arith.select %65, %59, %66 : vector<4x32xi1>, vector<4x32xf32>
    %68 = tpu.concatenate %37, %67 in 0 : vector<4x32xf32>, vector<4x32xf32> -> vector<8x32xf32>
    %69 = tpu.transpose %68, [1, 0] : vector<8x32xf32> -> vector<32x8xf32>
    %cst_39 = arith.constant 0.176776692 : f32
    %70 = vector.broadcast %cst_39 : f32 to vector<32x8xf32>
    %71 = arith.mulf %69, %70 : vector<32x8xf32>
    %cst_40 = arith.constant 0.000000e+00 : f32
    %72 = vector.broadcast %cst_40 : f32 to vector<1x8xf32>
    %73 = arith.cmpf ogt, %5, %72 : vector<1x8xf32>
    %cst_41 = arith.constant 1.000000e+00 : f32
    %cst_42 = arith.constant 0.000000e+00 : f32
    %74 = vector.broadcast %cst_41 : f32 to vector<1x8xf32>
    %75 = vector.broadcast %cst_42 : f32 to vector<1x8xf32>
    %76 = arith.select %73, %74, %75 : vector<1x8xi1>, vector<1x8xf32>
    %77 = vector.extract_strided_slice %7 {offsets = [0, 0], sizes = [8, 2], strides = [1, 1]} : vector<9x2xf32> to vector<8x2xf32>
    %c0_43 = arith.constant 0 : index
    %c0_44 = arith.constant 0 : index
    %c0_45 = arith.constant 0 : index
    %78 = vector.load %arg7[%c0_43, %c0_44, %c0_45] : memref<2x2x32xf32, #tpu.memory_space<vmem>>, vector<1x2x32xf32>
    %79 = vector.shape_cast %78 : vector<1x2x32xf32> to vector<2x32xf32>
    %cst_46 = arith.constant dense<0.000000e+00> : vector<8x32xf32>
    %80 = tpu.matmul %77, %79, %cst_46 {dimension_numbers = #tpu.dot_dimension_numbers<[1], [0], [0], [1], [0, 0, 1, 1], [], []>} : vector<8x2xf32>, vector<2x32xf32>, vector<8x32xf32> -> vector<8x32xf32>
    %c0_47 = arith.constant 0 : index
    %c0_48 = arith.constant 0 : index
    %c0_49 = arith.constant 0 : index
    %81 = vector.load %arg8[%c0_47, %c0_48, %c0_49] : memref<2x1x32xf32, #tpu.memory_space<vmem>>, vector<1x1x32xf32>
    %82 = vector.shape_cast %81 : vector<1x1x32xf32> to vector<1x32xf32>
    %83 = vector.broadcast %82 : vector<1x32xf32> to vector<8x32xf32>
    %84 = arith.addf %80, %83 : vector<8x32xf32>
    %cst_50 = arith.constant 0.000000e+00 : f32
    %85 = vector.broadcast %cst_50 : f32 to vector<8x32xf32>
    %86 = arith.maximumf %84, %85 : vector<8x32xf32>
    %cst_51 = arith.constant dense<0.000000e+00> : vector<8x8xf32>
    %87 = tpu.matmul %86, %71, %cst_51 {dimension_numbers = #tpu.dot_dimension_numbers<[1], [0], [0], [1], [0, 0, 1, 1], [], []>} : vector<8x32xf32>, vector<32x8xf32>, vector<8x8xf32> -> vector<8x8xf32>
    %cst_52 = arith.constant -1.000000e+09 : f32
    %88 = vector.shape_cast %73 : vector<1x8xi1> to vector<1x8xi1>
    %89 = vector.broadcast %88 : vector<1x8xi1> to vector<8x8xi1>
    %90 = vector.broadcast %cst_52 : f32 to vector<8x8xf32>
    %91 = arith.select %89, %87, %90 : vector<8x8xi1>, vector<8x8xf32>
    %cst_53 = arith.constant dense<0xFF800000> : vector<8xf32>
    %92 = vector.multi_reduction <maximumf>, %91, %cst_53 [1] : vector<8x8xf32> to vector<8xf32>
    %93 = vector.shape_cast %92 : vector<8xf32> to vector<8x1xf32>
    %94 = vector.broadcast %93 : vector<8x1xf32> to vector<8x8xf32>
    %95 = arith.subf %91, %94 : vector<8x8xf32>
    %96 = math.exp %95 : vector<8x8xf32>
    %97 = vector.broadcast %76 : vector<1x8xf32> to vector<8x8xf32>
    %98 = arith.mulf %96, %97 : vector<8x8xf32>
    %cst_54 = arith.constant dense<0.000000e+00> : vector<8xf32>
    %99 = vector.multi_reduction <add>, %98, %cst_54 [1] : vector<8x8xf32> to vector<8xf32>
    %100 = vector.shape_cast %99 : vector<8xf32> to vector<8x1xf32>
    %cst_55 = arith.constant 9.99999968E-21 : f32
    %101 = vector.broadcast %cst_55 : f32 to vector<8x1xf32>
    %102 = arith.maximumf %100, %101 : vector<8x1xf32>
    %103 = tpu.reciprocal %102 {approx = true} : vector<8x1xf32> -> vector<8x1xf32>
    %104 = vector.broadcast %103 : vector<8x1xf32> to vector<8x8xf32>
    %105 = arith.mulf %98, %104 : vector<8x8xf32>
    %cst_56 = arith.constant dense<0.000000e+00> : vector<8x32xf32>
    %106 = tpu.matmul %105, %68, %cst_56 {dimension_numbers = #tpu.dot_dimension_numbers<[1], [0], [0], [1], [0, 0, 1, 1], [], []>} : vector<8x8xf32>, vector<8x32xf32>, vector<8x32xf32> -> vector<8x32xf32>
    %107 = tpu.concatenate %86, %106 in 1 : vector<8x32xf32>, vector<8x32xf32> -> vector<8x64xf32>
    %c0_57 = arith.constant 0 : index
    %c0_58 = arith.constant 0 : index
    %c0_59 = arith.constant 0 : index
    %108 = vector.load %arg9[%c0_57, %c0_58, %c0_59] : memref<2x64x32xf32, #tpu.memory_space<vmem>>, vector<1x64x32xf32>
    %109 = vector.shape_cast %108 : vector<1x64x32xf32> to vector<64x32xf32>
    %cst_60 = arith.constant dense<0.000000e+00> : vector<8x32xf32>
    %110 = tpu.matmul %107, %109, %cst_60 {dimension_numbers = #tpu.dot_dimension_numbers<[1], [0], [0], [1], [0, 0, 1, 1], [], []>} : vector<8x64xf32>, vector<64x32xf32>, vector<8x32xf32> -> vector<8x32xf32>
    %c0_61 = arith.constant 0 : index
    %c0_62 = arith.constant 0 : index
    %c0_63 = arith.constant 0 : index
    %111 = vector.load %arg10[%c0_61, %c0_62, %c0_63] : memref<2x1x32xf32, #tpu.memory_space<vmem>>, vector<1x1x32xf32>
    %112 = vector.shape_cast %111 : vector<1x1x32xf32> to vector<1x32xf32>
    %113 = vector.broadcast %112 : vector<1x32xf32> to vector<8x32xf32>
    %114 = arith.addf %110, %113 : vector<8x32xf32>
    %cst_64 = arith.constant 0.000000e+00 : f32
    %115 = vector.broadcast %cst_64 : f32 to vector<8x32xf32>
    %116 = arith.maximumf %114, %115 : vector<8x32xf32>
    %c0_65 = arith.constant 0 : index
    %c0_66 = arith.constant 0 : index
    %c0_67 = arith.constant 0 : index
    %117 = vector.load %arg11[%c0_65, %c0_66, %c0_67] : memref<2x32x128xf32, #tpu.memory_space<vmem>>, vector<1x32x128xf32>
    %118 = vector.shape_cast %117 : vector<1x32x128xf32> to vector<32x128xf32>
    %cst_68 = arith.constant dense<0.000000e+00> : vector<8x128xf32>
    %119 = tpu.matmul %116, %118, %cst_68 {dimension_numbers = #tpu.dot_dimension_numbers<[1], [0], [0], [1], [0, 0, 1, 1], [], []>} : vector<8x32xf32>, vector<32x128xf32>, vector<8x128xf32> -> vector<8x128xf32>
    %c0_69 = arith.constant 0 : index
    %c0_70 = arith.constant 0 : index
    %c0_71 = arith.constant 0 : index
    %120 = vector.load %arg12[%c0_69, %c0_70, %c0_71] : memref<2x1x128xf32, #tpu.memory_space<vmem>>, vector<1x1x128xf32>
    %121 = vector.shape_cast %120 : vector<1x1x128xf32> to vector<1x128xf32>
    %122 = vector.broadcast %121 : vector<1x128xf32> to vector<8x128xf32>
    %123 = arith.addf %119, %122 : vector<8x128xf32>
    %124 = vector.extract_strided_slice %7 {offsets = [8, 0], sizes = [1, 2], strides = [1, 1]} : vector<9x2xf32> to vector<1x2xf32>
    %c1_72 = arith.constant 1 : index
    %c0_73 = arith.constant 0 : index
    %c0_74 = arith.constant 0 : index
    %125 = vector.load %arg7[%c1_72, %c0_73, %c0_74] : memref<2x2x32xf32, #tpu.memory_space<vmem>>, vector<1x2x32xf32>
    %126 = vector.shape_cast %125 : vector<1x2x32xf32> to vector<2x32xf32>
    %cst_75 = arith.constant dense<0.000000e+00> : vector<1x32xf32>
    %127 = tpu.matmul %124, %126, %cst_75 {dimension_numbers = #tpu.dot_dimension_numbers<[1], [0], [0], [1], [0, 0, 1, 1], [], []>} : vector<1x2xf32>, vector<2x32xf32>, vector<1x32xf32> -> vector<1x32xf32>
    %c1_76 = arith.constant 1 : index
    %c0_77 = arith.constant 0 : index
    %c0_78 = arith.constant 0 : index
    %128 = vector.load %arg8[%c1_76, %c0_77, %c0_78] : memref<2x1x32xf32, #tpu.memory_space<vmem>>, vector<1x1x32xf32>
    %129 = vector.shape_cast %128 : vector<1x1x32xf32> to vector<1x32xf32>
    %130 = arith.addf %127, %129 : vector<1x32xf32>
    %cst_79 = arith.constant 0.000000e+00 : f32
    %131 = vector.broadcast %cst_79 : f32 to vector<1x32xf32>
    %132 = arith.maximumf %130, %131 : vector<1x32xf32>
    %cst_80 = arith.constant dense<0.000000e+00> : vector<1x8xf32>
    %133 = tpu.matmul %132, %71, %cst_80 {dimension_numbers = #tpu.dot_dimension_numbers<[1], [0], [0], [1], [0, 0, 1, 1], [], []>} : vector<1x32xf32>, vector<32x8xf32>, vector<1x8xf32> -> vector<1x8xf32>
    %cst_81 = arith.constant -1.000000e+09 : f32
    %134 = vector.broadcast %cst_81 : f32 to vector<1x8xf32>
    %135 = arith.select %73, %133, %134 : vector<1x8xi1>, vector<1x8xf32>
    %cst_82 = arith.constant dense<0xFF800000> : vector<1xf32>
    %136 = vector.multi_reduction <maximumf>, %135, %cst_82 [1] : vector<1x8xf32> to vector<1xf32>
    %137 = vector.shape_cast %136 : vector<1xf32> to vector<1x1xf32>
    %138 = vector.broadcast %137 : vector<1x1xf32> to vector<1x8xf32>
    %139 = arith.subf %135, %138 : vector<1x8xf32>
    %140 = math.exp %139 : vector<1x8xf32>
    %141 = arith.mulf %140, %76 : vector<1x8xf32>
    %cst_83 = arith.constant dense<0.000000e+00> : vector<1xf32>
    %142 = vector.multi_reduction <add>, %141, %cst_83 [1] : vector<1x8xf32> to vector<1xf32>
    %143 = vector.shape_cast %142 : vector<1xf32> to vector<1x1xf32>
    %cst_84 = arith.constant 9.99999968E-21 : f32
    %144 = vector.broadcast %cst_84 : f32 to vector<1x1xf32>
    %145 = arith.maximumf %143, %144 : vector<1x1xf32>
    %146 = tpu.reciprocal %145 {approx = true} : vector<1x1xf32> -> vector<1x1xf32>
    %147 = vector.broadcast %146 : vector<1x1xf32> to vector<1x8xf32>
    %148 = arith.mulf %141, %147 : vector<1x8xf32>
    %cst_85 = arith.constant dense<0.000000e+00> : vector<1x32xf32>
    %149 = tpu.matmul %148, %68, %cst_85 {dimension_numbers = #tpu.dot_dimension_numbers<[1], [0], [0], [1], [0, 0, 1, 1], [], []>} : vector<1x8xf32>, vector<8x32xf32>, vector<1x32xf32> -> vector<1x32xf32>
    %150 = tpu.concatenate %132, %149 in 1 : vector<1x32xf32>, vector<1x32xf32> -> vector<1x64xf32>
    %c1_86 = arith.constant 1 : index
    %c0_87 = arith.constant 0 : index
    %c0_88 = arith.constant 0 : index
    %151 = vector.load %arg9[%c1_86, %c0_87, %c0_88] : memref<2x64x32xf32, #tpu.memory_space<vmem>>, vector<1x64x32xf32>
    %152 = vector.shape_cast %151 : vector<1x64x32xf32> to vector<64x32xf32>
    %cst_89 = arith.constant dense<0.000000e+00> : vector<1x32xf32>
    %153 = tpu.matmul %150, %152, %cst_89 {dimension_numbers = #tpu.dot_dimension_numbers<[1], [0], [0], [1], [0, 0, 1, 1], [], []>} : vector<1x64xf32>, vector<64x32xf32>, vector<1x32xf32> -> vector<1x32xf32>
    %c1_90 = arith.constant 1 : index
    %c0_91 = arith.constant 0 : index
    %c0_92 = arith.constant 0 : index
    %154 = vector.load %arg10[%c1_90, %c0_91, %c0_92] : memref<2x1x32xf32, #tpu.memory_space<vmem>>, vector<1x1x32xf32>
    %155 = vector.shape_cast %154 : vector<1x1x32xf32> to vector<1x32xf32>
    %156 = arith.addf %153, %155 : vector<1x32xf32>
    %cst_93 = arith.constant 0.000000e+00 : f32
    %157 = vector.broadcast %cst_93 : f32 to vector<1x32xf32>
    %158 = arith.maximumf %156, %157 : vector<1x32xf32>
    %c1_94 = arith.constant 1 : index
    %c0_95 = arith.constant 0 : index
    %c0_96 = arith.constant 0 : index
    %159 = vector.load %arg11[%c1_94, %c0_95, %c0_96] : memref<2x32x128xf32, #tpu.memory_space<vmem>>, vector<1x32x128xf32>
    %160 = vector.shape_cast %159 : vector<1x32x128xf32> to vector<32x128xf32>
    %cst_97 = arith.constant dense<0.000000e+00> : vector<1x128xf32>
    %161 = tpu.matmul %158, %160, %cst_97 {dimension_numbers = #tpu.dot_dimension_numbers<[1], [0], [0], [1], [0, 0, 1, 1], [], []>} : vector<1x32xf32>, vector<32x128xf32>, vector<1x128xf32> -> vector<1x128xf32>
    %c1_98 = arith.constant 1 : index
    %c0_99 = arith.constant 0 : index
    %c0_100 = arith.constant 0 : index
    %162 = vector.load %arg12[%c1_98, %c0_99, %c0_100] : memref<2x1x128xf32, #tpu.memory_space<vmem>>, vector<1x1x128xf32>
    %163 = vector.shape_cast %162 : vector<1x1x128xf32> to vector<1x128xf32>
    %164 = arith.addf %161, %163 : vector<1x128xf32>
    %165 = tpu.concatenate %123, %164 in 0 : vector<8x128xf32>, vector<1x128xf32> -> vector<9x128xf32>
    %c0_101 = arith.constant 0 : index
    %c0_102 = arith.constant 0 : index
    %c0_103 = arith.constant 0 : index
    %166 = vector.load %arg13[%c0_101, %c0_102, %c0_103] : memref<1x9x128xf32, #tpu.memory_space<vmem>>, vector<1x9x128xf32>
    %167 = vector.shape_cast %166 : vector<1x9x128xf32> to vector<9x128xf32>
    %168 = vector.shape_cast %165 : vector<9x128xf32> to vector<1x9x128xf32>
    tpu.vector_store %arg13[%c0_101, %c0_102, %c0_103], %168 {strides = array<i32>} : memref<1x9x128xf32, #tpu.memory_space<vmem>>, vector<1x9x128xf32>,
    return
  }
  func.func @transform_0(%arg0: i32) -> (i32, i32, i32, i32) {
    %c0_i32 = arith.constant 0 : i32
    %c0_i32_0 = arith.constant 0 : i32
    %c0_i32_1 = arith.constant 0 : i32
    %c0_i32_2 = arith.constant 0 : i32
    return %arg0, %c0_i32, %c0_i32_0, %c0_i32_1 : i32, i32, i32, i32
  }
  func.func @transform_1(%arg0: i32) -> (i32, i32, i32, i32) {
    %c0_i32 = arith.constant 0 : i32
    %c0_i32_0 = arith.constant 0 : i32
    %c0_i32_1 = arith.constant 0 : i32
    %c0_i32_2 = arith.constant 0 : i32
    return %arg0, %c0_i32, %c0_i32_0, %c0_i32_1 : i32, i32, i32, i32
  }
  func.func @transform_2(%arg0: i32) -> (i32, i32, i32) {
    %c0_i32 = arith.constant 0 : i32
    %c0_i32_0 = arith.constant 0 : i32
    %c0_i32_1 = arith.constant 0 : i32
    return %arg0, %c0_i32, %c0_i32_0 : i32, i32, i32
  }
  func.func @transform_3(%arg0: i32) -> (i32, i32, i32) {
    %c0_i32 = arith.constant 0 : i32
    %c0_i32_0 = arith.constant 0 : i32
    %c0_i32_1 = arith.constant 0 : i32
    return %arg0, %c0_i32, %c0_i32_0 : i32, i32, i32
  }
  func.func @transform_4(%arg0: i32) -> (i32, i32, i32) {
    %c0_i32 = arith.constant 0 : i32
    %c0_i32_0 = arith.constant 0 : i32
    %c0_i32_1 = arith.constant 0 : i32
    %c0_i32_2 = arith.constant 0 : i32
    return %c0_i32, %c0_i32_0, %c0_i32_1 : i32, i32, i32
  }
  func.func @transform_5(%arg0: i32) -> (i32, i32, i32) {
    %c0_i32 = arith.constant 0 : i32
    %c0_i32_0 = arith.constant 0 : i32
    %c0_i32_1 = arith.constant 0 : i32
    %c0_i32_2 = arith.constant 0 : i32
    return %c0_i32, %c0_i32_0, %c0_i32_1 : i32, i32, i32
  }
  func.func @transform_6(%arg0: i32) -> (i32, i32, i32) {
    %c0_i32 = arith.constant 0 : i32
    %c0_i32_0 = arith.constant 0 : i32
    %c0_i32_1 = arith.constant 0 : i32
    %c0_i32_2 = arith.constant 0 : i32
    return %c0_i32, %c0_i32_0, %c0_i32_1 : i32, i32, i32
  }
  func.func @transform_7(%arg0: i32) -> (i32, i32, i32) {
    %c0_i32 = arith.constant 0 : i32
    %c0_i32_0 = arith.constant 0 : i32
    %c0_i32_1 = arith.constant 0 : i32
    %c0_i32_2 = arith.constant 0 : i32
    return %c0_i32, %c0_i32_0, %c0_i32_1 : i32, i32, i32
  }
  func.func @transform_8(%arg0: i32) -> (i32, i32, i32) {
    %c0_i32 = arith.constant 0 : i32
    %c0_i32_0 = arith.constant 0 : i32
    %c0_i32_1 = arith.constant 0 : i32
    %c0_i32_2 = arith.constant 0 : i32
    return %c0_i32, %c0_i32_0, %c0_i32_1 : i32, i32, i32
  }
  func.func @transform_9(%arg0: i32) -> (i32, i32, i32) {
    %c0_i32 = arith.constant 0 : i32
    %c0_i32_0 = arith.constant 0 : i32
    %c0_i32_1 = arith.constant 0 : i32
    %c0_i32_2 = arith.constant 0 : i32
    return %c0_i32, %c0_i32_0, %c0_i32_1 : i32, i32, i32
  }
  func.func @transform_10(%arg0: i32) -> (i32, i32, i32) {
    %c0_i32 = arith.constant 0 : i32
    %c0_i32_0 = arith.constant 0 : i32
    %c0_i32_1 = arith.constant 0 : i32
    %c0_i32_2 = arith.constant 0 : i32
    return %c0_i32, %c0_i32_0, %c0_i32_1 : i32, i32, i32
  }
  func.func @transform_11(%arg0: i32) -> (i32, i32, i32) {
    %c0_i32 = arith.constant 0 : i32
    %c0_i32_0 = arith.constant 0 : i32
    %c0_i32_1 = arith.constant 0 : i32
    %c0_i32_2 = arith.constant 0 : i32
    return %c0_i32, %c0_i32_0, %c0_i32_1 : i32, i32, i32
  }
  func.func @transform_12(%arg0: i32) -> (i32, i32, i32) {
    %c0_i32 = arith.constant 0 : i32
    %c0_i32_0 = arith.constant 0 : i32
    %c0_i32_1 = arith.constant 0 : i32
    return %arg0, %c0_i32, %c0_i32_0 : i32, i32, i32
  }
}

</mosaic_0001>

<bundles_post_ra>
// kernel: tpu_custom_call.1
= control target key start
LH: loop header
LB: loop body
LE: loop exit
PB: predicated region body
PF: predicated region fallthrough
CT: control target
= control target key end

     0   :  { %s2197_s21 = smov 0   ;;  %s2492_s0 = inlined_call_operand.vmem [shape: f32[2,2,32,8], index: 0, kind: input, shape index: {}]   ;;  %s2493_s1 = inlined_call_operand.vmem [shape: f32[2,2,4,8], index: 1, kind: input, shape index: {}]   ;;  %s2494_s2 = inlined_call_operand.vmem [shape: f32[2,1,8], index: 2, kind: input, shape index: {}]   ;;  %s2495_s3 = inlined_call_operand.vmem [shape: f32[2,9,2], index: 3, kind: input, shape index: {}]   ;;  %s2496_s4 = inlined_call_operand.vmem [shape: f32[2,8,32], index: 4, kind: input, shape index: {}]   ;;  %s2497_s5 = inlined_call_operand.vmem [shape: f32[2,1,32], index: 5, kind: input, shape index: {}]   ;;  %s2498_s6 = inlined_call_operand.vmem [shape: f32[2,2,32], index: 6, kind: input, shape index: {}]   ;;  %s2499_s7 = inlined_call_operand.vmem [shape: f32[2,1,32], index: 7, kind: input, shape index: {}]   ;;  %s2500_s8 = inlined_call_operand.vmem [shape: f32[2,64,32], index: 8, kind: input, shape index: {}]   ;;  %s2501_s9 = inlined_call_operand.vmem [shape: f32[2,1,32], index: 9, kind: input, shape index: {}]   ;;  %s2502_s10 = inlined_call_operand.vmem [shape: f32[2,32,128], index: 10, kind: input, shape index: {}]   ;;  %s2503_s11 = inlined_call_operand.vmem [shape: f32[2,1,128], index: 11, kind: input, shape index: {}]   ;;  %s2504_s12 = inlined_call_operand.vmem [shape: f32[2,9,128], index: 12, kind: output, shape index: {}]  }
   0x1 LB: > { %s1864_s22 = sadd.s32 4294967295, %s2126_s21   ;;  %p1868_p0 = scmp.ge.s32.totalorder %s2126_s21, 1  ;;  %s2126_s21 = sphi %s2197_s21, %s22_s21  }
   0x2   : > { %p390_p1 = scmp.lt.s32.totalorder %s2126_s21, 3 }
   0x4   : > { %p391_p2 = pnand %p1868_p0, %p390_p1 }
   0x5   : > { %p445_p3 = scmp.lt.s32.totalorder (!%p391_p2), %s1864_s22, 1  ;;  %s2131_s23 = smov (!%p391_p2), 32  }
   0x6   : > { %394 = sbr.rel (%p391_p2) target bundleno = 2817 (0xb01), region = 68 }
   0xb   : > { %v481_v0 = vld [vmem:[%s2496_s4] sm:$0xff]  ;;  %v1882_v1 = vld [vmem:[%s2496_s4 + $0x8] sm:$0xff]  ;;  %v591_v2 = vlaneseq  ;;  %s2506_s22 = smov (!%p445_p3, %s1864_s22), 1  ;;  %vm489_vm0 = vcmask 64512   ;;  %vm936_vm1 = vcmask 1041408   ;;  %v2128_v23 = vmov 0.0  }
   0xc   : > { %1982 = vmatprep.subr.mxu0 %v481_v0  ;;  %1990 = vmatprep.subr.mxu1 %v1882_v1  ;;  %s1922_s27 = sshll.u32 %s2506_s22, 6  ;;  %s1923_s28 = sshll.u32 %s2506_s22, 3  ;;  %v924_v22 = vld [vmem:[%s2498_s6] sm:$0x3]  ;;  %vm2129_vm2 = vmmov 0   ;;  %vm932_vm3 = vcmask 15360  }
   0xd   : > { %1983 = vmatpush3.msra.mxu0 %v481_v0  ;;  %1991 = vmatpush3.msra.mxu1 %v1882_v1  ;;  %v592_v3 = vshrl.u32 %v591_v2, 7  ;;  %s449_s13 = scalar_lea.vmem %s2492_s0, %s1922_s27  ;;  %s454_s16 = scalar_lea.vmem %s2493_s1, %s1923_s28  ;;  %vm664_vm4 = vcmask 60416   ;;  %v1877_v35 = vld [vmem:[%s2497_s5] ss:$0 sm:$0xff]  ;;  %v1884_v36 = vld [vmem:[%s2497_s5 + $0x1] ss:$0 sm:$0xff] }
   0xe   : > { %v468_v6 = vld [vmem:[%s449_s13] sm:$0xff]  ;;  %v469_v8 = vld [vmem:[%s449_s13 + $0x8] sm:$0xff]  ;;  %v470_v10 = vld [vmem:[%s449_s13 + $0x10] sm:$0xff]  ;;  %s1924_s17 = sshll.u32 %s2506_s22, 4  ;;  %1998 = vmatprep.subr.mxu0 %v2128_v23  ;;  %2003 = vmatprep.subr.mxu1 %v2128_v23  ;;  %vm635_vm5 = vcmask 261120   ;;  %vm675_vm14 = vcmask 1041409   ;;  %s457_s15 = scalar_lea.vmem %s2494_s2, %s2506_s22 }
   0xf   : > { %v607_v4 = vsub.s32 2, %v592_v3  ;;  %v2221_v5 = vsub.s32 0, %v592_v3  ;;  %v472_v7 = vld [vmem:[%s449_s13 + $0x20] sm:$0xff]  ;;  %1984 = vmatprep.mubr.msk.f32.mxu0 %vm489_vm0, %v468_v6  ;;  %v473_v9 = vld [vmem:[%s449_s13 + $0x28] sm:$0xff]  ;;  %v474_v11 = vld [vmem:[%s449_s13 + $0x30] sm:$0xff]  ;;  %v600_v12 = vsub.s32 1, %v592_v3  ;;  %s2240_s24 = scalar_lea.vmem %s2495_s3, %s1924_s17  ;;  %s2417_s25 = scalar_lea.vmem %s2504_s12, %s1924_s17 }
  0x10   : > { %1992 = vmatprep.mubr.msk.f32.mxu1 %vm489_vm0, %v472_v7  ;;  %1985 = vmatmul.mubr.msk.f32.vlgmr.msra.gmra.mxu0 %vm489_vm0, %v469_v8  ;;  %v477_v13 = vld [vmem:[%s454_s16 + $0x4] sm:$0xf]  ;;  %v471_v14 = vld [vmem:[%s449_s13 + $0x18] sm:$0xff]  ;;  %v476_v17 = vld [vmem:[%s454_s16] sm:$0xf]  ;;  %v614_v19 = vsub.s32 3, %v592_v3 }
  0x11   : > { %1993 = vmatmul.mubr.msk.f32.vlgmr.msra.gmra.mxu1 %vm489_vm0, %v473_v9  ;;  %1987 = vmatprep.mubr.msk.f32.mxu0 %vm489_vm0, %v470_v10  ;;  %v475_v15 = vld [vmem:[%s449_s13 + $0x38] sm:$0xff]  ;;  %v811_v16 = vrot.slane %v477_v13, %v607_v4  ;;  %v797_v18 = vrot.slane %v477_v13, %v2221_v5  ;;  %v594_v20 = vrot.slane %v476_v17, %v2221_v5  ;;  %v479_v24 = vld [vmem:[%s2240_s24] sm:$0xff]  ;;  %v866_v29 = vsel %vm664_vm4, %v477_v13, -inf }
  0x12   : > { %1995 = vmatprep.mubr.msk.f32.mxu1 %vm489_vm0, %v474_v11  ;;  %v804_v21 = vrot.slane %v477_v13, %v600_v12  ;;  %1999 = vmatpush3.msk.msra.mxu0 %vm936_vm1, %v924_v22  ;;  %v818_v25 = vrot.slane %v477_v13, %v614_v19  ;;  %v601_v26 = vrot.slane %v476_v17, %v600_v12  ;;  %v665_v30 = vsel %vm664_vm4, %v476_v17, -inf }
  0x13   : > { %813 = vbcast.lane.b32.xlu1 %v811_v16, 256  ;;  %799 = vbcast.lane.b32.xlu0 %v797_v18, 256  ;;  %v615_v27 = vrot.slane %v476_v17, %v614_v19  ;;  %v608_v28 = vrot.slane %v476_v17, %v607_v4  ;;  %vm677_vm15 = vcmask 1042434   ;;  %vm679_vm4 = vcmask 1043459  }
  0x14   : > { %1988 = vmatmul.mubr.msk.f32.gmra.mxu0 %vm489_vm0, %v471_v14  ;;  %2014 = vmatprep.subr.mxu0 %v2128_v23 }
  0x15   : > { %1996 = vmatmul.mubr.msk.f32.gmra.mxu1 %vm489_vm0, %v475_v15  ;;  %2000 = vmatprep.mubr.msk.f32.mxu0 %vm2129_vm2, %v2128_v23 }
  0x16   : > { %2011 = vmatprep.mubr.msk.f32.mxu1 %vm2129_vm2, %v2128_v23 }
  0x17   : > { %596 = vbcast.lane.b32.xlu1 %v594_v20, 256  ;;  %806 = vbcast.lane.b32.xlu0 %v804_v21, 256 }
  0x18   : > { %2001 = vmatmul.mubr.msk.f32.vlgmr.msra.gmra.mxu0 %vm932_vm3, %v479_v24 }
  0x19   : > { %2016 = vmatprep.mubr.msk.f32.mxu0 %vm2129_vm2, %v2128_v23 }
  0x1b   : > { %820 = vbcast.lane.b32.xlu1 %v818_v25, 256  ;;  %603 = vbcast.lane.b32.xlu0 %v601_v26, 256 }
  0x1f   : > { %617 = vbcast.lane.b32.xlu1 %v615_v27, 256  ;;  %610 = vbcast.lane.b32.xlu0 %v608_v28, 256 }
  0x3e   : > { %867 = vmax.xlane.f32.xlu0 %v866_v29 }
  0x43   : > { %666 = vmax.xlane.f32.xlu1 %v665_v30 }
  0x85   : > { %v2256_v31 = vpop.permute.xlu1 %813  ;;  %v800_v32 = vpop.permute.xlu0 %799 }
  0x86   : > { %vm822_vm6 = vcmp.gt.f32.partialorder %v800_v32, 0.0  ;;  %vm824_vm12 = vcmp.gt.f32.partialorder %v2256_v31, 0.0 }
  0x89   : > { %v597_v33 = vpop.permute.xlu1 %596  ;;  %v807_v34 = vpop.permute.xlu0 %806 }
  0x8a   : > { %vm619_vm7 = vcmp.gt.f32.partialorder %v597_v33, 0.0  ;;  %vm823_vm8 = vcmp.gt.f32.partialorder %v807_v34, 0.0 }
  0x8d   : > { %v821_v37 = vpop.permute.xlu1 %820  ;;  %v604_v40 = vpop.permute.xlu0 %603 }
  0x8e   : > { %vm620_vm9 = vcmp.gt.f32.partialorder %v604_v40, 0.0  ;;  %vm825_vm10 = vcmp.gt.f32.partialorder %v821_v37, 0.0 }
  0x91   : > { %v618_v55 = vpop.permute.xlu1 %617  ;;  %v611_v9 = vpop.permute.xlu0 %610 }
  0x92   : > { %vm622_vm11 = vcmp.gt.f32.partialorder %v618_v55, 0.0  ;;  %vm621_vm13 = vcmp.gt.f32.partialorder %v611_v9, 0.0 }
  0xd0   : > { %v1986_v38 = vpop.f32.mrf.mxu0 }
  0xd1   : > { %v1994_v39 = vpop.f32.mrf.mxu1  ;;  %v574_v41 = vadd.f32 %v1986_v38, %v1877_v35 }
  0xd2   : > { %v777_v42 = vadd.f32 %v1994_v39, %v1884_v36  ;;  %v568_v43 = vpop.f32.mrf.mxu0 }
  0xd3   : > { %v771_v44 = vpop.f32.mrf.mxu1  ;;  %v588_v45 = vmax.f32 %v574_v41, 0.0  ;;  %v569_v47 = vadd.f32 %v1877_v35, %v568_v43 }
  0xd4   : > { %v791_v46 = vmax.f32 %v777_v42, 0.0  ;;  %v772_v48 = vadd.f32 %v1884_v36, %v771_v44  ;;  %v1989_v49 = vpop.f32.mrf.mxu0 }
  0xd5   : > { %v1997_v50 = vpop.f32.mrf.mxu1  ;;  %v632_v51 = vsel %vm620_vm9, %v588_v45, -1e+09  ;;  %v587_v53 = vmax.f32 %v569_v47, 0.0  ;;  %v584_v58 = vadd.f32 %v1989_v49, %v1877_v35 }
  0xd6   : > { %v835_v52 = vsel %vm823_vm8, %v791_v46, -1e+09  ;;  %v790_v54 = vmax.f32 %v772_v48, 0.0  ;;  %v643_v56 = vsel %vm635_vm5, %v632_v51, -inf  ;;  %v787_v59 = vadd.f32 %v1997_v50, %v1884_v36  ;;  %v578_v0 = vpop.f32.mrf.mxu0 }
  0xd7   : > { %v845_v57 = vsel %vm635_vm5, %v835_v52, -inf  ;;  %v644_v60 = vrot.slane %v643_v56, 4  ;;  %v631_v62 = vsel %vm619_vm7, %v587_v53, -1e+09  ;;  %v781_v1 = vpop.f32.mrf.mxu1  ;;  %v590_v4 = vmax.f32 %v584_v58, 0.0 }
  0xd8   : > { %v846_v61 = vrot.slane %v845_v57, 4  ;;  %v834_v63 = vsel %vm822_vm6, %v790_v54, -1e+09  ;;  %v636_v2 = vsel %vm635_vm5, %v631_v62, -inf  ;;  %v793_v6 = vmax.f32 %v787_v59, 0.0 }
  0xd9   : > { %v838_v3 = vsel %vm635_vm5, %v834_v63, -inf  ;;  %v637_v7 = vrot.slane %v636_v2, 4  ;;  %v634_v10 = vsel %vm622_vm11, %v590_v4, -1e+09  ;;  %v579_v12 = vadd.f32 %v1877_v35, %v578_v0 }
  0xda   : > { %v839_v8 = vrot.slane %v838_v3, 4  ;;  %v837_v11 = vsel %vm825_vm10, %v793_v6, -1e+09  ;;  %v782_v13 = vadd.f32 %v1884_v36, %v781_v1  ;;  %v645_v14 = vmax.f32 %v643_v56, %v644_v60 }
  0xdb   : > { %v847_v15 = vmax.f32 %v845_v57, %v846_v61  ;;  %v638_v16 = vmax.f32 %v636_v2, %v637_v7  ;;  %v657_v18 = vsel %vm635_vm5, %v634_v10, -inf  ;;  %v859_v19 = vsel %vm635_vm5, %v837_v11, -inf  ;;  %v868_v57 = vpop.xlane.xlu0 %867  ;;  %v667_v2 = vpop.xlane.xlu1 %666 }
  0xdc   : > { %v840_v17 = vmax.f32 %v838_v3, %v839_v8  ;;  %v589_v20 = vmax.f32 %v579_v12, 0.0  ;;  %v792_v21 = vmax.f32 %v782_v13, 0.0  ;;  %v658_v25 = vrot.slane %v657_v18, 4 }
  0xdd   : > { %v639_v22 = vrot.slane %v638_v16, 2  ;;  %v860_v26 = vrot.slane %v859_v19, 4  ;;  %v646_v29 = vrot.slane %v645_v14, 2  ;;  %v848_v30 = vrot.slane %v847_v15, 2 }
  0xde   : > { %v841_v24 = vrot.slane %v840_v17, 2  ;;  %v633_v27 = vsel %vm621_vm13, %v589_v20, -1e+09  ;;  %v836_v28 = vsel %vm824_vm12, %v792_v21, -1e+09  ;;  %v659_v32 = vmax.f32 %v657_v18, %v658_v25 }
  0xdf   : > { %v861_v33 = vmax.f32 %v859_v19, %v860_v26  ;;  %v650_v34 = vsel %vm635_vm5, %v633_v27, -inf  ;;  %v852_v35 = vsel %vm635_vm5, %v836_v28, -inf  ;;  %v640_v36 = vmax.f32 %v638_v16, %v639_v22  ;;  %v1006_v16 = vpop.f32.mrf.mxu0  ;;  %v1889_v21 = vld [vmem:[%s2499_s7] ss:$0 sm:$0xff] }
  0xe0   : > { %v842_v37 = vmax.f32 %v840_v17, %v841_v24  ;;  %v660_v38 = vrot.slane %v659_v32, 2  ;;  %v651_v31 = vrot.slane %v650_v34, 4  ;;  %v853_v40 = vrot.slane %v852_v35, 4 }
  0xe1   : > { %v862_v39 = vrot.slane %v861_v33, 2  ;;  %v647_v41 = vmax.f32 %v645_v14, %v646_v29  ;;  %v849_v42 = vmax.f32 %v847_v15, %v848_v30  ;;  %v641_v45 = vrot.slane %v640_v36, 1  ;;  %v2002_v17 = vpop.f32.mrf.mxu0  ;;  %v2311_v30 = vld [vmem:[%s457_s15] sm:$0x1] }
  0xe2   : > { %v652_v43 = vmax.f32 %v650_v34, %v651_v31  ;;  %v854_v44 = vmax.f32 %v852_v35, %v853_v40  ;;  %v843_v46 = vrot.slane %v842_v37, 1  ;;  %v661_v47 = vmax.f32 %v659_v32, %v660_v38 }
  0xe3   : > { %v863_v48 = vmax.f32 %v861_v33, %v862_v39  ;;  %v648_v51 = vrot.slane %v647_v41, 1  ;;  %v850_v52 = vrot.slane %v849_v42, 1  ;;  %v642_v55 = vmax.f32 %v640_v36, %v641_v45 }
  0xe4   : > { %v653_v49 = vrot.slane %v652_v43, 2  ;;  %v855_v50 = vrot.slane %v854_v44, 2  ;;  %v844_v56 = vmax.f32 %v842_v37, %v843_v46  ;;  %v662_v59 = vrot.slane %v661_v47, 1 }
  0xe5   : > { %v864_v58 = vrot.slane %v863_v48, 1  ;;  %v649_v62 = vmax.f32 %v647_v41, %v648_v51  ;;  %v851_v63 = vmax.f32 %v849_v42, %v850_v52  ;;  %vm869_vm6 = vcmp.gt.f32.partialorder %v868_v57, 0.0  ;;  %v1193_v51 = vld [vmem:[%s2500_s8 + $0x28] sm:$0xff]  ;;  %v1192_v52 = vld [vmem:[%s2500_s8 + $0x20] sm:$0xff]  ;;  %v1281_v57 = vld [vmem:[%s2502_s10 + $0x18] sm:$0xff] }
  0xe6   : > { %v654_v53 = vmax.f32 %v652_v43, %v653_v49  ;;  %v856_v54 = vmax.f32 %v854_v44, %v855_v50  ;;  %v663_v6 = vmax.f32 %v661_v47, %v662_v59  ;;  %vm668_vm7 = vcmp.gt.f32.partialorder %v667_v2, 0.0  ;;  %v1195_v50 = vld [vmem:[%s2500_s8 + $0x38] sm:$0xff] }
  0xe7   : > { %v865_v3 = vmax.f32 %v863_v48, %v864_v58  ;;  %v876_v4 = vsel %vm675_vm14, %v851_v63, %v844_v56  ;;  %v676_v7 = vsel %vm675_vm14, %v649_v62, %v642_v55  ;;  %vm884_vm8 = vcmask 1043456   ;;  %v1189_v55 = vld [vmem:[%s2500_s8 + $0x8] sm:$0xff]  ;;  %v1188_v56 = vld [vmem:[%s2500_s8] sm:$0xff]  ;;  %v1280_v62 = vld [vmem:[%s2502_s10 + $0x10] sm:$0xff] }
  0xe8   : > { %v655_v60 = vrot.slane %v654_v53, 1  ;;  %v857_v61 = vrot.slane %v856_v54, 1  ;;  %v2285_v25 = vadd.f32 %v1889_v21, %v1006_v16  ;;  %vm922_vm9 = vcmp.gt.f32.partialorder %v2311_v30, 0.0  ;;  %v1279_v63 = vld [vmem:[%s2502_s10 + $0x8] sm:$0xff]  ;;  %v1911_v30 = vld [vmem:[%s2500_s8 + $0x78] sm:$0xff] }
  0xe9   : > { %v2130_v32 = vmov 0   ;;  %v2321_v41 = vsel %vm922_vm9, 1.0, %v2128_v23  ;;  %vm1203_vm11 = vcmask 523264  }
  0xea   : > { %v656_v0 = vmax.f32 %v654_v53, %v655_v60  ;;  %v858_v1 = vmax.f32 %v856_v54, %v857_v61  ;;  %v1010_v28 = vmax.f32 %v2285_v25, 0.0  ;;  %v1084_v33 = vsel %vm922_vm9, 1, %v2130_v32  ;;  %v1191_v53 = vld [vmem:[%s2500_s8 + $0x18] sm:$0xff]  ;;  %v1190_v54 = vld [vmem:[%s2500_s8 + $0x10] sm:$0xff] }
  0xeb   : > { %v1088_v34 = vrot.slane %v1084_v33, %v2221_v5  ;;  %v1101_v42 = vrot.slane %v2321_v41, %v2221_v5  ;;  %v1194_v5 = vld [vmem:[%s2500_s8 + $0x30] sm:$0xff] }
  0xec   : > { %v877_v8 = vsel %vm677_vm15, %v858_v1, %v876_v4  ;;  %v678_v9 = vsel %vm677_vm15, %v656_v0, %v676_v7  ;;  %v1278_v0 = vld [vmem:[%s2502_s10] sm:$0xff] }
  0xed   : > { %v878_v10 = vsel %vm679_vm4, %v865_v3, %v877_v8  ;;  %v680_v11 = vsel %vm679_vm4, %v663_v6, %v678_v9  ;;  %vm1089_vm10 = vcmp.eq.s32.totalorder %v1088_v34, 1  ;;  %v1894_v1 = vld [vmem:[%s2501_s9] ss:$0 sm:$0xff]  ;;  %v1898_v7 = vld [vmem:[%s2498_s6 + $0x2] sm:$0x3] }
  0xee   : > { %v880_v12 = vsel %vm869_vm6, %v878_v10, 0.0  ;;  %v682_v14 = vsel %vm668_vm7, %v680_v11, 0.0  ;;  %v480_v8 = vld [vmem:[%s2240_s24 + $0x8] sm:$0x1]  ;;  %v1896_v9 = vld [vmem:[%s2503_s11] ss:$0 sm:$0xff] }
  0xef   : > { %v882_v13 = vrot.slane %v880_v12, 4 }
  0xf1   : > { %v2275_v15 = vsel %vm884_vm8, %v682_v14, %v882_v13  ;;  %v1899_v13 = vld [vmem:[%s2499_s7 + $0x1] sm:$0x1] }
  0xf2   : > { %886 = vxpose.xlu0.b32.start.end [1/1] (short) (narrow) %v2275_v15, 32  ;;  %2015 = vmatpush3.msra.mxu0 %v2275_v15 }
  0xf3   : > { %2038 = vmatprep.subr.mxu0 %v2128_v23 }
 0x16e   : > { %v902_v18 = vpop.trf.xlu0 }
 0x16f   : > { %v2296_v29 = vmul.f32 0.17677669, %v902_v18 }
 0x172   : > { %v903_v19 = vpop.trf.xlu0 }
 0x173   : > { %v2291_v27 = vmul.f32 0.17677669, %v903_v19 }
 0x176   : > { %v904_v20 = vpop.trf.xlu0 }
 0x177   : > { %v2287_v26 = vmul.f32 0.17677669, %v904_v20 }
 0x17a   : > { %v905_v22 = vpop.trf.xlu0 }
 0x17b   : > { %v2283_v24 = vmul.f32 0.17677669, %v905_v22 }
 0x17d   : > { %2004 = vmatpush3.msra.mxu1 %v2283_v24 }
 0x17e   : > { %2005 = vmatprep.subr.mxu1 %v2128_v23 }
 0x17f   : > { %2006 = vmatpush3.msra.mxu1 %v2287_v26 }
 0x180   : > { %2007 = vmatprep.subr.mxu1 %v2128_v23 }
 0x181   : > { %2008 = vmatpush3.msra.mxu1 %v2291_v27 }
 0x182   : > { %2009 = vmatprep.subr.mxu1 %v2128_v23 }
 0x183   : > { %2010 = vmatpush3.msra.mxu1 %v2296_v29 }
 0x184   : > { %2012 = vmatmul.mubr.msk.f32.vlgmr.msra.gmra.mxu1 %vm635_vm5, %v1010_v28  ;;  %2019 = vmatprep.subr.mxu1 %v2128_v23 }
 0x185   : > { %2035 = vmatprep.mubr.msk.f32.mxu1 %vm2129_vm2, %v2128_v23  ;;  %2020 = vmatpush3.msra.mxu1 %v1195_v50 }
 0x186   : > { %2021 = vmatprep.subr.mxu1 %v2128_v23 }
 0x187   : > { %2022 = vmatpush3.msra.mxu1 %v1194_v5 }
 0x188   : > { %2023 = vmatprep.subr.mxu1 %v2128_v23 }
 0x189   : > { %2024 = vmatpush3.msra.mxu1 %v1193_v51 }
 0x18a   : > { %2025 = vmatprep.subr.mxu1 %v2128_v23 }
 0x18b   : > { %2026 = vmatpush3.msra.mxu1 %v1192_v52 }
 0x18c   : > { %2027 = vmatprep.subr.mxu1 %v2128_v23 }
 0x18d   : > { %2028 = vmatpush3.msra.mxu1 %v1191_v53  ;;  %v1918_v53 = vld [vmem:[%s2503_s11 + $0x1] sm:$0x1] }
 0x18e   : > { %2029 = vmatprep.subr.mxu1 %v2128_v23 }
 0x18f   : > { %2030 = vmatpush3.msra.mxu1 %v1190_v54 }
 0x190   : > { %2031 = vmatprep.subr.mxu1 %v2128_v23 }
 0x191   : > { %2032 = vmatpush3.msra.mxu1 %v1189_v55 }
 0x192   : > { %2033 = vmatprep.subr.mxu1 %v2128_v23 }
 0x193   : > { %2034 = vmatpush3.msra.mxu1 %v1188_v56 }
 0x194   : > { %2065 = vmatprep.subr.mxu1 %v2128_v23 }
 0x244   : > { %v1080_v35 = vpop.f32.mrf.mxu1 }
 0x245   : > { %v1090_v36 = vsel %vm1089_vm10, %v1080_v35, -1e+09  ;;  %v1910_v35 = vld [vmem:[%s2500_s8 + $0x70] sm:$0xff] }
 0x246   : > { %v2013_v37 = vpop.f32.mrf.mxu1  ;;  %v1091_v38 = vsel %vm489_vm0, %v1090_v36, -inf }
 0x247   : > { %1092 = vmax.xlane.f32.xlu1 %v1091_v38  ;;  %v1908_v37 = vld [vmem:[%s2500_s8 + $0x60] sm:$0xff]  ;;  %v1907_v38 = vld [vmem:[%s2500_s8 + $0x58] sm:$0xff] }
 0x2d0   : > { %v1093_v39 = vpop.xlane.xlu1 %1092 }
 0x2d1   : > { %v1094_v31 = vsub.f32 %v1090_v36, %v1093_v39  ;;  %v1909_v36 = vld [vmem:[%s2500_s8 + $0x68] sm:$0xff]  ;;  %v1906_v39 = vld [vmem:[%s2500_s8 + $0x50] sm:$0xff] }
 0x2d3   : > { %v1095_v40 = vmul.f32 1.442695, %v1094_v31  ;;  %v1905_v31 = vld [vmem:[%s2500_s8 + $0x48] sm:$0xff] }
 0x2d5   : > { %2112 = vpow2.f32 %v1095_v40  ;;  %v1904_v40 = vld [vmem:[%s2500_s8 + $0x40] sm:$0xff] }
 0x2e2   : > { %v2113_v43 = vpop.eup %2112 }
 0x2e3   : > { %v1103_v44 = vmul.f32 %v2113_v43, %v1101_v42 }
 0x2e5   : > { %v1104_v45 = vsel %vm489_vm0, %v1103_v44, 0.0 }
 0x2e6   : > { %1105 = vadd.xlane.f32.xlu1 %v1104_v45 }
 0x36f   : > { %v1106_v46 = vpop.xlane.xlu1 %1105 }
 0x370   : > { %v1107_v47 = vmax.f32 %v1106_v46, 1e-20  ;;  %v1916_v46 = vld [vmem:[%s2502_s10 + $0x30] sm:$0xff] }
 0x372   : > { %2114 = vrcp.f32 %v1107_v47  ;;  %v1915_v47 = vld [vmem:[%s2502_s10 + $0x28] sm:$0xff] }
 0x37f   : > { %v2115_v48 = vpop.eup %2114 }
 0x380   : > { %v1109_v49 = vmul.f32 %v2115_v48, %v1103_v44  ;;  %v1914_v48 = vld [vmem:[%s2502_s10 + $0x20] sm:$0xff] }
 0x382   : > { %2017 = vmatmul.mubr.msk.f32.vlgmr.msra.gmra.mxu0 %vm489_vm0, %v1109_v49  ;;  %v1912_v49 = vld [vmem:[%s2501_s9 + $0x1] sm:$0x1] }
 0x383   : > { %2046 = vmatprep.mubr.msk.f32.mxu0 %vm2129_vm2, %v2128_v23  ;;  %2039 = vmatpush3.msra.mxu0 %v1281_v57 }
 0x384   : > { %2040 = vmatprep.subr.mxu0 %v2128_v23 }
 0x385   : > { %2041 = vmatpush3.msra.mxu0 %v1280_v62 }
 0x386   : > { %2042 = vmatprep.subr.mxu0 %v2128_v23 }
 0x387   : > { %2043 = vmatpush3.msra.mxu0 %v1279_v63 }
 0x388   : > { %2044 = vmatprep.subr.mxu0 %v2128_v23 }
 0x389   : > { %2045 = vmatpush3.msra.mxu0 %v1278_v0 }
 0x38a   : > { %2049 = vmatprep.subr.mxu0 %v2128_v23 }
 0x442   : > { %v1179_v58 = vpop.f32.mrf.mxu0 }
 0x443   : > { %1184 = vrot.lane.b32.xlu1 %v1179_v58, %s2131_s23 }
 0x444   : > { %v2018_v59 = vpop.f32.mrf.mxu0 }
 0x4b5   : > { %v1185_v60 = vpop.permute.xlu1 %1184 }
 0x4b6   : > { %v1187_v61 = vsel %vm635_vm5, %v1010_v28, %v1185_v60 }
 0x4b7   : > { %2036 = vmatmul.mubr.msk.f32.vlgmr.msra.gmra.mxu1 %vm1203_vm11, %v1187_v61 }
 0x4b8   : > { %2066 = vmatpush3.msra.mxu1 %v2275_v15  ;;  %2067 = vmatprep.mubr.msk.f32.mxu1 %vm2129_vm2, %v2128_v23 }
 0x4b9   : > { %2070 = vmatprep.subr.mxu1 %v2128_v23 }
 0x577   : > { %v1273_v2 = vpop.f32.mrf.mxu1 }
 0x578   : > { %v1274_v3 = vadd.f32 %v1894_v1, %v1273_v2 }
 0x579   : > { %v2037_v4 = vpop.f32.mrf.mxu1 }
 0x57a   : > { %v1277_v6 = vmax.f32 %v1274_v3, 0.0 }
 0x57c   : > { %2047 = vmatmul.mubr.msk.f32.vlgmr.msra.gmra.mxu0 %vm635_vm5, %v1277_v6 }
 0x57d   : > { %2050 = vmatpush3.msk.msra.mxu0 %vm936_vm1, %v1898_v7  ;;  %2051 = vmatprep.mubr.msk.f32.mxu0 %vm2129_vm2, %v2128_v23  ;;  %vm1517_vm1 = vcmask 57344  }
 0x57e   : > { %2054 = vmatprep.subr.mxu0 %v2128_v23 }
 0x580   : > { %2052 = vmatmul.mubr.msk.f32.vlgmr.msra.gmra.mxu0 %vm932_vm3, %v480_v8 }
 0x581   : > { %2055 = vmatpush3.msra.mxu0 %v2283_v24  ;;  %2062 = vmatprep.mubr.msk.f32.mxu0 %vm2129_vm2, %v2128_v23 }
 0x582   : > { %2056 = vmatprep.subr.mxu0 %v2128_v23 }
 0x583   : > { %2057 = vmatpush3.msra.mxu0 %v2287_v26 }
 0x584   : > { %2058 = vmatprep.subr.mxu0 %v2128_v23 }
 0x585   : > { %2059 = vmatpush3.msra.mxu0 %v2291_v27 }
 0x586   : > { %2060 = vmatprep.subr.mxu0 %v2128_v23 }
 0x587   : > { %2061 = vmatpush3.msra.mxu0 %v2296_v29 }
 0x588   : > { %2089 = vmatprep.subr.mxu0 %v2128_v23 }
 0x63c   : > { %v1358_v10 = vpop.f32.mrf.mxu0 }
 0x63d   : > { %v1359_v11 = vadd.f32 %v1896_v9, %v1358_v10 }
 0x63e   : > { %v2048_v12 = vpop.f32.mrf.mxu0 }
 0x63f   : > { %1774 = vst [vmem:[%s2417_s25] sm:$0xff] %v1359_v11 }
 0x640   : > { %v1438_v14 = vpop.f32.mrf.mxu0 }
 0x641   : > { %v1439_v15 = vadd.f32 %v1899_v13, %v1438_v14 }
 0x642   : > { %v2053_v16 = vpop.f32.mrf.mxu0 }
 0x643   : > { %v1442_v17 = vmax.f32 %v1439_v15, 0.0 }
 0x645   : > { %2063 = vmatmul.mubr.msk.f32.vlgmr.msra.gmra.mxu0 %vm635_vm5, %v1442_v17 }
 0x646   : > { %2097 = vmatprep.mubr.msk.f32.mxu0 %vm2129_vm2, %v2128_v23 }
 0x705   : > { %v1512_v18 = vpop.f32.mrf.mxu0 }
 0x706   : > { %v1516_v19 = vsel %vm922_vm9, %v1512_v18, -1e+09 }
 0x707   : > { %v2064_v20 = vpop.f32.mrf.mxu0  ;;  %v1518_v21 = vsel %vm1517_vm1, %v1516_v19, -inf }
 0x708   : > { %1519 = vmax.xlane.f32.xlu1 %v1518_v21 }
 0x791   : > { %v1520_v22 = vpop.xlane.xlu1 %1519 }
 0x792   : > { %v1521_v24 = vsub.f32 %v1516_v19, %v1520_v22 }
 0x794   : > { %v1522_v25 = vmul.f32 1.442695, %v1521_v24 }
 0x796   : > { %2116 = vpow2.f32 %v1522_v25 }
 0x7a3   : > { %v2117_v26 = vpop.eup %2116 }
 0x7a4   : > { %v1524_v27 = vmul.f32 %v2117_v26, %v2321_v41  ;;  %v1917_v41 = vld [vmem:[%s2502_s10 + $0x38] sm:$0xff] }
 0x7a5   : > { %2090 = vmatpush3.msra.mxu0 %v1917_v41 }
 0x7a6   : > { %v1525_v28 = vsel %vm1517_vm1, %v1524_v27, 0.0  ;;  %2091 = vmatprep.subr.mxu0 %v2128_v23 }
 0x7a7   : > { %1526 = vadd.xlane.f32.xlu0 %v1525_v28  ;;  %2092 = vmatpush3.msra.mxu0 %v1916_v46 }
 0x7a8   : > { %2093 = vmatprep.subr.mxu0 %v2128_v23 }
 0x7a9   : > { %2094 = vmatpush3.msra.mxu0 %v1915_v47 }
 0x7aa   : > { %2095 = vmatprep.subr.mxu0 %v2128_v23 }
 0x7ab   : > { %2096 = vmatpush3.msra.mxu0 %v1914_v48 }
 0x830   : > { %v1527_v29 = vpop.xlane.xlu0 %1526 }
 0x831   : > { %v1528_v32 = vmax.f32 %v1527_v29, 1e-20 }
 0x833   : > { %2118 = vrcp.f32 %v1528_v32 }
 0x840   : > { %v2119_v33 = vpop.eup %2118 }
 0x841   : > { %v1530_v34 = vmul.f32 %v2119_v33, %v1524_v27 }
 0x843   : > { %2068 = vmatmul.mubr.msk.f32.vlgmr.msra.gmra.mxu1 %vm489_vm0, %v1530_v34 }
 0x844   : > { %2086 = vmatprep.mubr.msk.f32.mxu1 %vm2129_vm2, %v2128_v23  ;;  %2071 = vmatpush3.msra.mxu1 %v1911_v30 }
 0x845   : > { %2072 = vmatprep.subr.mxu1 %v2128_v23 }
 0x846   : > { %2073 = vmatpush3.msra.mxu1 %v1910_v35 }
 0x847   : > { %2074 = vmatprep.subr.mxu1 %v2128_v23 }
 0x848   : > { %2075 = vmatpush3.msra.mxu1 %v1909_v36 }
 0x849   : > { %2076 = vmatprep.subr.mxu1 %v2128_v23 }
 0x84a   : > { %2077 = vmatpush3.msra.mxu1 %v1908_v37 }
 0x84b   : > { %2078 = vmatprep.subr.mxu1 %v2128_v23 }
 0x84c   : > { %2079 = vmatpush3.msra.mxu1 %v1907_v38 }
 0x84d   : > { %2080 = vmatprep.subr.mxu1 %v2128_v23 }
 0x84e   : > { %2081 = vmatpush3.msra.mxu1 %v1906_v39 }
 0x84f   : > { %2082 = vmatprep.subr.mxu1 %v2128_v23 }
 0x850   : > { %2083 = vmatpush3.msra.mxu1 %v1905_v31 }
 0x851   : > { %2084 = vmatprep.subr.mxu1 %v2128_v23 }
 0x852   : > { %2085 = vmatpush3.msra.mxu1 %v1904_v40 }
 0x903   : > { %v1600_v42 = vpop.f32.mrf.mxu1 }
 0x904   : > { %1605 = vrot.lane.b32.xlu1 %v1600_v42, %s2131_s23 }
 0x905   : > { %v2069_v43 = vpop.f32.mrf.mxu1 }
 0x976   : > { %v1606_v44 = vpop.permute.xlu1 %1605 }
 0x977   : > { %v1608_v45 = vsel %vm635_vm5, %v1442_v17, %v1606_v44 }
 0x978   : > { %2087 = vmatmul.mubr.msk.f32.vlgmr.msra.gmra.mxu1 %vm1203_vm11, %v1608_v45 }
 0xa38   : > { %v1689_v50 = vpop.f32.mrf.mxu1 }
 0xa39   : > { %v1690_v5 = vadd.f32 %v1912_v49, %v1689_v50 }
 0xa3a   : > { %v2088_v51 = vpop.f32.mrf.mxu1 }
 0xa3b   : > { %v1693_v52 = vmax.f32 %v1690_v5, 0.0 }
 0xa3d   : > { %2098 = vmatmul.mubr.msk.f32.vlgmr.msra.gmra.mxu0 %vm635_vm5, %v1693_v52 }
 0xafd   : > { %v1770_v54 = vpop.f32.mrf.mxu0 }
 0xafe   : > { %v1771_v55 = vadd.f32 %v1918_v53, %v1770_v54 }
 0xaff   : > { %v2099_v56 = vpop.f32.mrf.mxu0 }
 0xb00   : > { %1775 = vst [vmem:[%s2417_s25 + $0x8] sm:$0x1] %v1771_v55 }
 0xb01 PF: > { %s22_s21 = sadd.s32 1, %s2126_s21  }
 0xb02   : > { %p19_p4 = scmp.ge.s32.totalorder %s22_s21, 4  }
 0xb04   :  { %21 = sbr.rel (!%p19_p4) target bundleno = 1 (0x1), region = 115 }

</bundles_post_ra>
